<compile_context>
chip_gen: v7x
topology: tpu7x:2x2x1
jax: 0.10.0
libtpu: 0.0.40
codegen_flags: <defaults>
</compile_context>

<pallas_src>
import functools

import jax
import jax.numpy as jnp
import numpy as np
from jax.experimental import pallas as pl
from jax.experimental.pallas import tpu as pltpu


# ----------------------------------------------------------------------------
# Configuration (small, consistent with the module)
# ----------------------------------------------------------------------------
B = 2              # batch
H = W = 8          # input_resolution
C = 64             # dim  (2C = 128 -> lane-dense output)
L = H * W
C4 = 4 * C         # 256
C2 = 2 * C         # 128
M = B * (H // 2) * (W // 2)   # rows after patch merge = 32
GRID_ROWS = 2                 # 2-way parallel split (v7x dual-TC friendly)
ROWS = M // GRID_ROWS         # 16 rows per block (multiple of 8)
EPS = 1e-5                    # nn.LayerNorm default


# ----------------------------------------------------------------------------
# Fused Pallas kernel: reduction matmul + LayerNorm(2C)
# ----------------------------------------------------------------------------
def patch_merge_kernel(x_ref, w_ref, g_ref, b_ref, o_ref):
    # x_ref: [ROWS, 4C]  w_ref: [4C, 2C]  g/b_ref: [1, 2C]  o_ref: [ROWS, 2C]
    y = jnp.dot(x_ref[...], w_ref[...], preferred_element_type=jnp.float32)
    mu = jnp.mean(y, axis=-1, keepdims=True)
    var = jnp.mean(jnp.square(y - mu), axis=-1, keepdims=True)
    o_ref[...] = (y - mu) * jax.lax.rsqrt(var + EPS) * g_ref[...] + b_ref[...]


@jax.jit
def patch_merging_pallas(x, w_red, gamma, beta):
    # --- JAX glue: 2x2 even/odd patch gather (exactly matches torch slicing) ---
    xi = x.reshape(B, H, W, C)
    x0 = xi[:, 0::2, 0::2, :]
    x1 = xi[:, 1::2, 0::2, :]
    x2 = xi[:, 0::2, 1::2, :]
    x3 = xi[:, 1::2, 1::2, :]
    xm = jnp.concatenate([x0, x1, x2, x3], axis=-1).reshape(M, C4)

    out = pl.pallas_call(
        patch_merge_kernel,
        out_shape=jax.ShapeDtypeStruct((M, C2), jnp.float32),
        grid=(GRID_ROWS,),
        in_specs=[
            pl.BlockSpec((ROWS, C4), lambda i: (i, 0)),   # activations (tiled rows)
            pl.BlockSpec((C4, C2), lambda i: (0, 0)),     # reduction weight (resident)
            pl.BlockSpec((1, C2), lambda i: (0, 0)),      # LN gamma
            pl.BlockSpec((1, C2), lambda i: (0, 0)),      # LN beta
        ],
        out_specs=pl.BlockSpec((ROWS, C2), lambda i: (i, 0)),
        compiler_params=pltpu.CompilerParams(
            dimension_semantics=("parallel",)),
    )(xm, w_red, gamma, beta)

    return out.reshape(B, (H // 2) * (W // 2), C2)


# ----------------------------------------------------------------------------
# Pure-JAX reference (same math, no Pallas) for validation
# ----------------------------------------------------------------------------
def patch_merging_ref(x, w_red, gamma, beta):
    xi = x.reshape(B, H, W, C)
    x0 = xi[:, 0::2, 0::2, :]
    x1 = xi[:, 1::2, 0::2, :]
    x2 = xi[:, 0::2, 1::2, :]
    x3 = xi[:, 1::2, 1::2, :]
    xm = jnp.concatenate([x0, x1, x2, x3], axis=-1).reshape(B, -1, C4)
    y = xm @ w_red                                            # Linear, bias=False
    mu = y.mean(-1, keepdims=True)
    var = ((y - mu) ** 2).mean(-1, keepdims=True)
    return (y - mu) / jnp.sqrt(var + EPS) * gamma + beta      # LayerNorm(2C)


# ----------------------------------------------------------------------------
# Deterministic parameter init + run
# ----------------------------------------------------------------------------
def init_params(key):
    k0, k1, k2 = jax.random.split(key, 3)
    return {
        # reduction weight stored as [in=4C, out=2C] (== torch weight.T)
        "w_red": (0.05 * jax.random.normal(k0, (C4, C2))).astype(jnp.float32),
        # LayerNorm affine params kept 2-D [1, 2C] for TPU-friendly layout
        "gamma": (1.0 + 0.1 * jax.random.normal(k1, (1, C2))).astype(jnp.float32),
        "beta": (0.1 * jax.random.normal(k2, (1, C2))).astype(jnp.float32),
    }


if __name__ == "__main__":
    key = jax.random.PRNGKey(0)
    pkey, xkey = jax.random.split(key)
    params = init_params(pkey)
    x = jax.random.normal(xkey, (B, L, C), dtype=jnp.float32)   # [2, 64, 64]

    out = patch_merging_pallas(x, params["w_red"], params["gamma"], params["beta"])
    out = jax.block_until_ready(out)

    ref = patch_merging_ref(x, params["w_red"], params["gamma"], params["beta"])
    assert out.shape == (B, (H // 2) * (W // 2), C2), out.shape
    np.testing.assert_allclose(np.asarray(out), np.asarray(ref),
                               rtol=1e-4, atol=1e-4)
    print("KERNEL_OK")
</pallas_src>

<mosaic_0001>
module attributes {stable_mosaic.version = 11 : i64} {
  func.func @patch_merge_kernel(%arg0: i32, %arg1: memref<16x256xf32, #tpu.memory_space<vmem>>, %arg2: memref<256x128xf32, #tpu.memory_space<vmem>>, %arg3: memref<1x128xf32, #tpu.memory_space<vmem>>, %arg4: memref<1x128xf32, #tpu.memory_space<vmem>>, %arg5: memref<16x128xf32, #tpu.memory_space<vmem>>) attributes {dimension_semantics = [#tpu.dimension_semantics<parallel>], iteration_bounds = array<i64: 2>, scalar_prefetch = 0 : i64, scratch_operands = 0 : i64, tpu.core_type = #tpu.core_type<tc>, window_params = [{transform_indices = @transform_0, window_bounds = array<i64: 16, 256>}, {pipeline_mode = #tpu.pipeline_mode<synchronous>, transform_indices = @transform_1, window_bounds = array<i64: 256, 128>}, {pipeline_mode = #tpu.pipeline_mode<synchronous>, transform_indices = @transform_2, window_bounds = array<i64: 1, 128>}, {pipeline_mode = #tpu.pipeline_mode<synchronous>, transform_indices = @transform_3, window_bounds = array<i64: 1, 128>}, {transform_indices = @transform_4, window_bounds = array<i64: 16, 128>}]} {
    %c0 = arith.constant 0 : index
    %c0_0 = arith.constant 0 : index
    %0 = vector.load %arg1[%c0, %c0_0] : memref<16x256xf32, #tpu.memory_space<vmem>>, vector<16x256xf32>
    %c0_1 = arith.constant 0 : index
    %c0_2 = arith.constant 0 : index
    %1 = vector.load %arg2[%c0_1, %c0_2] : memref<256x128xf32, #tpu.memory_space<vmem>>, vector<256x128xf32>
    %cst = arith.constant dense<0.000000e+00> : vector<16x128xf32>
    %2 = tpu.matmul %0, %1, %cst {dimension_numbers = #tpu.dot_dimension_numbers<[1], [0], [0], [1], [0, 0, 1, 1], [], []>} : vector<16x256xf32>, vector<256x128xf32>, vector<16x128xf32> -> vector<16x128xf32>
    %cst_3 = arith.constant dense<0.000000e+00> : vector<16xf32>
    %3 = vector.multi_reduction <add>, %2, %cst_3 [1] : vector<16x128xf32> to vector<16xf32>
    %4 = vector.shape_cast %3 : vector<16xf32> to vector<16x1xf32>
    %cst_4 = arith.constant 1.280000e+02 : f32
    %5 = vector.broadcast %cst_4 : f32 to vector<16x1xf32>
    %6 = arith.divf %4, %5 : vector<16x1xf32>
    %7 = vector.broadcast %6 : vector<16x1xf32> to vector<16x128xf32>
    %8 = arith.subf %2, %7 : vector<16x128xf32>
    %9 = arith.mulf %8, %8 : vector<16x128xf32>
    %cst_5 = arith.constant dense<0.000000e+00> : vector<16xf32>
    %10 = vector.multi_reduction <add>, %9, %cst_5 [1] : vector<16x128xf32> to vector<16xf32>
    %11 = vector.shape_cast %10 : vector<16xf32> to vector<16x1xf32>
    %cst_6 = arith.constant 1.280000e+02 : f32
    %12 = vector.broadcast %cst_6 : f32 to vector<16x1xf32>
    %13 = arith.divf %11, %12 : vector<16x1xf32>
    %14 = vector.broadcast %6 : vector<16x1xf32> to vector<16x128xf32>
    %15 = arith.subf %2, %14 : vector<16x128xf32>
    %cst_7 = arith.constant 9.99999974E-6 : f32
    %16 = vector.broadcast %cst_7 : f32 to vector<16x1xf32>
    %17 = arith.addf %13, %16 : vector<16x1xf32>
    %18 = math.rsqrt %17 : vector<16x1xf32>
    %19 = vector.broadcast %18 : vector<16x1xf32> to vector<16x128xf32>
    %20 = arith.mulf %15, %19 : vector<16x128xf32>
    %c0_8 = arith.constant 0 : index
    %c0_9 = arith.constant 0 : index
    %21 = vector.load %arg3[%c0_8, %c0_9] : memref<1x128xf32, #tpu.memory_space<vmem>>, vector<1x128xf32>
    %22 = vector.broadcast %21 : vector<1x128xf32> to vector<16x128xf32>
    %23 = arith.mulf %20, %22 : vector<16x128xf32>
    %c0_10 = arith.constant 0 : index
    %c0_11 = arith.constant 0 : index
    %24 = vector.load %arg4[%c0_10, %c0_11] : memref<1x128xf32, #tpu.memory_space<vmem>>, vector<1x128xf32>
    %25 = vector.broadcast %24 : vector<1x128xf32> to vector<16x128xf32>
    %26 = arith.addf %23, %25 : vector<16x128xf32>
    %c0_12 = arith.constant 0 : index
    %c0_13 = arith.constant 0 : index
    %27 = vector.load %arg5[%c0_12, %c0_13] : memref<16x128xf32, #tpu.memory_space<vmem>>, vector<16x128xf32>
    tpu.vector_store %arg5[%c0_12, %c0_13], %26 {strides = array<i32>} : memref<16x128xf32, #tpu.memory_space<vmem>>, vector<16x128xf32>,
    return
  }
  func.func @transform_0(%arg0: i32) -> (i32, i32) {
    %c0_i32 = arith.constant 0 : i32
    %c0_i32_0 = arith.constant 0 : i32
    return %arg0, %c0_i32 : i32, i32
  }
  func.func @transform_1(%arg0: i32) -> (i32, i32) {
    %c0_i32 = arith.constant 0 : i32
    %c0_i32_0 = arith.constant 0 : i32
    %c0_i32_1 = arith.constant 0 : i32
    return %c0_i32, %c0_i32_0 : i32, i32
  }
  func.func @transform_2(%arg0: i32) -> (i32, i32) {
    %c0_i32 = arith.constant 0 : i32
    %c0_i32_0 = arith.constant 0 : i32
    %c0_i32_1 = arith.constant 0 : i32
    return %c0_i32, %c0_i32_0 : i32, i32
  }
  func.func @transform_3(%arg0: i32) -> (i32, i32) {
    %c0_i32 = arith.constant 0 : i32
    %c0_i32_0 = arith.constant 0 : i32
    %c0_i32_1 = arith.constant 0 : i32
    return %c0_i32, %c0_i32_0 : i32, i32
  }
  func.func @transform_4(%arg0: i32) -> (i32, i32) {
    %c0_i32 = arith.constant 0 : i32
    %c0_i32_0 = arith.constant 0 : i32
    return %arg0, %c0_i32 : i32, i32
  }
}

</mosaic_0001>

<bundles_post_ra>
// kernel: patch_merging_pallas.1
= control target key start
LH: loop header
LB: loop body
LE: loop exit
PB: predicated region body
PF: predicated region fallthrough
CT: control target
= control target key end

     0   :  { %9 = vsyncpa [#allocation3], 0  ;;  %s882_s0 = inlined_call_operand.vmem [shape: f32[32,256], index: 0, kind: input, shape index: {}]   ;;  %s883_s1 = inlined_call_operand.vmem [shape: f32[256,128], index: 1, kind: input, shape index: {}]   ;;  %s884_s2 = inlined_call_operand.vmem [shape: f32[1,128], index: 2, kind: input, shape index: {}]   ;;  %s885_s3 = inlined_call_operand.vmem [shape: f32[1,128], index: 3, kind: input, shape index: {}]   ;;  %s886_s4 = inlined_call_operand.hbm [shape: f32[32,128], index: 4, kind: output, shape index: {}]  }
   0x1   :  { %11 = vsyncpa [#allocation3 + $0x1], 0  ;;  %s672_s15 = smov 0   ;;  %s674_s16 = smov 0  }
   0x2   :  { %s676_s17 = smov 0   ;;  %s678_s18 = smov 0  }
   0x3 LB: > { %s693_s19 = sadd.s32 4294967295, %s642_s18   ;;  %s432_s20 = sadd.s32 4294967294, %s642_s18   ;;  %s642_s18 = sphi %s678_s18, %s892_s18   ;;  %s638_s17 = sphi %s676_s17, %s891_s17   ;;  %s634_s16 = sphi %s674_s16, %s890_s16   ;;  %s630_s15 = sphi %s672_s15, %s889_s15  }
   0x4   : > { %s697_s21 = sadd.s32 1, %s642_s18   ;;  %s113_s22 = sadd.s32 1, %s638_s17 }
   0x5   : > { %s110_s23 = ssub.s32 %s642_s18, %s697_s21  ;;  %p123_p0 = scmp.ne.s32.totalorder %s638_s17, %s634_s16 }
   0x6   : > { %p111_p1 = scmp.eq.s32.totalorder %s110_s23, 0  ;;  %p124_p2 = scmp.eq.s32.totalorder %s693_s19, 1 }
   0x7   : > { %p129_p3 = scmp.ne.s32.totalorder %s634_s16, %s630_s15  ;;  %p130_p4 = scmp.eq.s32.totalorder %s432_s20, 1 }
   0x8   : > { %s708_s24 = scalar_select %p111_p1, %s638_s17, %s113_s22  }
   0x9   : > { %p710_p5 = por %p124_p2, %p123_p0  ;;  %p714_p6 = por %p130_p4, %p129_p3 }
   0xa   : > { %p435_p7 = scmp.ge.s32.totalorder %s642_s18, 1  ;;  %p167_p8 = scmp.lt.s32.totalorder %s642_s18, 3 }
   0xc   : > { %p168_p9 = pnand %p435_p7, %p167_p8 }
   0xd   : > { %v222_v0 = vld [vmem:[%s883_s1 + $0x80] sm:$0xff] (!%p168_p9)  ;;  %v223_v1 = vld [vmem:[%s883_s1 + $0x88] sm:$0xff] (!%p168_p9)  ;;  %s437_s7 = sshll.u32 (!%p168_p9), %s693_s19, 1  ;;  %v224_v5 = vld [vmem:[%s883_s1 + $0x90] sm:$0xff] (!%p168_p9) }
   0xe   : > { %171 = sbr.rel (%p168_p9) target bundleno = 593 (0x251), region = 36  ;;  %v206_v2 = vld [vmem:[%s883_s1] sm:$0xff] (!%p168_p9)  ;;  %v487_v3 = vpack.c.bf16 (!%p168_p9), %v223_v1, %v222_v0  ;;  %v207_v4 = vld [vmem:[%s883_s1 + $0x8] sm:$0xff] (!%p168_p9)  ;;  %v225_v6 = vld [vmem:[%s883_s1 + $0x98] sm:$0xff] (!%p168_p9)  ;;  %p195_p10 = scmp.lt.s32.totalorder (!%p168_p9), %s437_s7, 3 }
   0xf   : > { %v489_v7 = vpack.c.bf16 (!%p168_p9), %v207_v4, %v206_v2  ;;  %v491_v8 = vpack.c.bf16 (!%p168_p9), %v225_v6, %v224_v5  ;;  %v208_v9 = vld [vmem:[%s883_s1 + $0x10] sm:$0xff] (!%p168_p9)  ;;  %v209_v10 = vld [vmem:[%s883_s1 + $0x18] sm:$0xff] (!%p168_p9)  ;;  %v226_v11 = vld [vmem:[%s883_s1 + $0xa0] sm:$0xff] (!%p168_p9) }
  0x10   : > { %488 = vmatprep.subr.bf16.mxu0 (!%p168_p9), %v487_v3  ;;  %519 = vmatprep.subr.bf16.mxu1 (!%p168_p9), %v487_v3  ;;  %v227_v12 = vld [vmem:[%s883_s1 + $0xa8] sm:$0xff] (!%p168_p9)  ;;  %v493_v13 = vpack.c.bf16 (!%p168_p9), %v209_v10, %v208_v9  ;;  %v210_v15 = vld [vmem:[%s883_s1 + $0x20] sm:$0xff] (!%p168_p9)  ;;  %v228_v17 = vld [vmem:[%s883_s1 + $0xb0] sm:$0xff] (!%p168_p9) }
  0x11   : > { %490 = vmatpush3.bf16.msra.mxu0 (!%p168_p9), %v489_v7  ;;  %527 = vmatpush3.bf16.msra.mxu1 (!%p168_p9), %v489_v7  ;;  %v495_v14 = vpack.c.bf16 (!%p168_p9), %v227_v12, %v226_v11  ;;  %v211_v16 = vld [vmem:[%s883_s1 + $0x28] sm:$0xff] (!%p168_p9)  ;;  %v229_v18 = vld [vmem:[%s883_s1 + $0xb8] sm:$0xff] (!%p168_p9)  ;;  %v212_v21 = vld [vmem:[%s883_s1 + $0x30] sm:$0xff] (!%p168_p9) }
  0x12   : > { %492 = vmatprep.subr.bf16.mxu0 (!%p168_p9), %v491_v8  ;;  %520 = vmatprep.subr.bf16.mxu1 (!%p168_p9), %v491_v8  ;;  %v497_v19 = vpack.c.bf16 (!%p168_p9), %v211_v16, %v210_v15  ;;  %v499_v20 = vpack.c.bf16 (!%p168_p9), %v229_v18, %v228_v17  ;;  %v213_v22 = vld [vmem:[%s883_s1 + $0x38] sm:$0xff] (!%p168_p9)  ;;  %v230_v23 = vld [vmem:[%s883_s1 + $0xc0] sm:$0xff] (!%p168_p9)  ;;  %v231_v24 = vld [vmem:[%s883_s1 + $0xc8] sm:$0xff] (!%p168_p9) }
  0x13   : > { %v501_v27 = vpack.c.bf16 (!%p168_p9), %v213_v22, %v212_v21  ;;  %v503_v28 = vpack.c.bf16 (!%p168_p9), %v231_v24, %v230_v23  ;;  %v214_v29 = vld [vmem:[%s883_s1 + $0x40] sm:$0xff] (!%p168_p9)  ;;  %v215_v30 = vld [vmem:[%s883_s1 + $0x48] sm:$0xff] (!%p168_p9)  ;;  %v232_v31 = vld [vmem:[%s883_s1 + $0xd0] sm:$0xff] (!%p168_p9) }
  0x14   : > { %v233_v32 = vld [vmem:[%s883_s1 + $0xd8] sm:$0xff] (!%p168_p9)  ;;  %v505_v33 = vpack.c.bf16 (!%p168_p9), %v215_v30, %v214_v29  ;;  %v216_v35 = vld [vmem:[%s883_s1 + $0x50] sm:$0xff] (!%p168_p9)  ;;  %v234_v37 = vld [vmem:[%s883_s1 + $0xe0] sm:$0xff] (!%p168_p9) }
  0x15   : > { %s894_s7 = smov (!%p195_p10, %s437_s7), 3  ;;  %494 = vmatpush3.bf16.msra.mxu0 %v493_v13  ;;  %528 = vmatpush3.bf16.msra.mxu1 %v493_v13  ;;  %v507_v34 = vpack.c.bf16 %v233_v32, %v232_v31  ;;  %v217_v36 = vld [vmem:[%s883_s1 + $0x58] sm:$0xff]  ;;  %v235_v38 = vld [vmem:[%s883_s1 + $0xe8] sm:$0xff]  ;;  %v218_v41 = vld [vmem:[%s883_s1 + $0x60] sm:$0xff] }
  0x16   : > { %s447_s10 = sshll.u32 %s894_s7, 4  ;;  %496 = vmatprep.subr.bf16.mxu0 %v495_v14  ;;  %521 = vmatprep.subr.bf16.mxu1 %v495_v14  ;;  %v509_v39 = vpack.c.bf16 %v217_v36, %v216_v35  ;;  %v511_v40 = vpack.c.bf16 %v235_v38, %v234_v37  ;;  %v219_v42 = vld [vmem:[%s883_s1 + $0x68] sm:$0xff]  ;;  %v236_v43 = vld [vmem:[%s883_s1 + $0xf0] sm:$0xff]  ;;  %v237_v44 = vld [vmem:[%s883_s1 + $0xf8] sm:$0xff] }
  0x17   : > { %s766_s23 = scalar_lea.vmem %s882_s0, %s447_s10  ;;  %v513_v45 = vpack.c.bf16 %v219_v42, %v218_v41  ;;  %v515_v46 = vpack.c.bf16 %v237_v44, %v236_v43  ;;  %v220_v47 = vld [vmem:[%s883_s1 + $0x70] sm:$0xff]  ;;  %v221_v48 = vld [vmem:[%s883_s1 + $0x78] sm:$0xff]  ;;  %v440_v9 = vld [vmem:[%s884_s2] ss:$0 sm:$0xff]  ;;  %s448_s10 = sshll.u32 %s693_s19, 8 }
  0x18   : > { %v203_v25 = vld [vmem:[%s766_s23 + $0x8] sm:$0xff]  ;;  %v205_v26 = vld [vmem:[%s766_s23 + $0x18] sm:$0xff]  ;;  %v517_v49 = vpack.c.bf16 %v221_v48, %v220_v47  ;;  %v202_v50 = vld [vmem:[%s766_s23] sm:$0xff]  ;;  %s837_s20 = scalar_lea.hbm %s886_s4, %s448_s10  ;;  %s644_s19 = smov [#allocation2]  }
  0x19   : > { %302 = vmatprep.mubr.f32.mxu0 %v203_v25  ;;  %498 = vmatpush3.bf16.msra.mxu0 %v497_v19  ;;  %v204_v51 = vld [vmem:[%s766_s23 + $0x10] sm:$0xff]  ;;  %s191_s23 = sand.u32 1, %s634_s16   ;;  %v441_v11 = vld [vmem:[%s885_s3] ss:$0 sm:$0xff]  ;;  %s584_s27 = sshll.u32 %s644_s19, 4  ;;  %s585_s27 = int_to_ptr.vmem [resolvable:$false] %s584_s27 }
  0x1a   : > { %529 = vmatpush3.bf16.msra.mxu1 %v497_v19  ;;  %500 = vmatprep.subr.bf16.mxu0 %v499_v20  ;;  %s436_s6 = sshll.u32 %s191_s23, 4  ;;  %s841_s22 = scalar_lea.sflag [#allocation3], %s191_s23 }
  0x1b   : > { %522 = vmatprep.subr.bf16.mxu1 %v499_v20  ;;  %307 = vmatprep.mubr.f32.mxu1 %v205_v26  ;;  %s193_s11 = scalar_lea.vmem [#allocation2], %s436_s6  ;;  %s586_s28 = scalar_lea.vmem %s585_s27, 512 }
  0x1c   : > { %s370_s12 = sshll.u32 %s193_s11, 4  ;;  %s839_s12 = int_to_ptr.vmem [resolvable:$true] %s370_s12 }
  0x1d   : > { %502 = vmatpush3.bf16.msra.mxu0 %v501_v27  ;;  %s580_s7 = scalar_lea.vmem %s839_s12, 256  ;;  %p587_p0 = scmp.lt.s32.totalorder %s839_s12, %s585_s27 }
  0x1e   : > { %530 = vmatpush3.bf16.msra.mxu1 %v501_v27  ;;  %504 = vmatprep.subr.bf16.mxu0 %v503_v28  ;;  %p581_p11 = scmp.ne.s32.totalorder %s839_s12, %s580_s7  ;;  %p588_p1 = scmp.lt.s32.totalorder %s586_s28, %s580_s7 }
  0x1f   : > { %523 = vmatprep.subr.bf16.mxu1 %v503_v28 }
  0x20   : > { %p582_p12 = pnand %p581_p11, %p710_p5  ;;  %p589_p2 = por %p588_p1, %p587_p0 }
  0x21   : > { %506 = vmatpush3.bf16.msra.mxu0 %v505_v33 }
  0x22   : > { %531 = vmatpush3.bf16.msra.mxu1 %v505_v33  ;;  %508 = vmatprep.subr.bf16.mxu0 %v507_v34  ;;  %p583_p13 = pneg %p582_p12 }
  0x23   : > { %524 = vmatprep.subr.bf16.mxu1 %v507_v34 }
  0x24   : > { %p590_p3 = pnand %p589_p2, %p583_p13 }
  0x25   : > { %510 = vmatpush3.bf16.msra.mxu0 %v509_v39 }
  0x26   : > { %532 = vmatpush3.bf16.msra.mxu1 %v509_v39  ;;  %512 = vmatprep.subr.bf16.mxu0 %v511_v40 }
  0x27   : > { %525 = vmatprep.subr.bf16.mxu1 %v511_v40 }
  0x29   : > { %514 = vmatpush3.bf16.msra.mxu0 %v513_v45 }
  0x2a   : > { %533 = vmatpush3.bf16.msra.mxu1 %v513_v45  ;;  %516 = vmatprep.subr.bf16.mxu0 %v515_v46 }
  0x2b   : > { %526 = vmatprep.subr.bf16.mxu1 %v515_v46 }
  0x2d   : > { %518 = vmatpush3.bf16.msra.mxu0 %v517_v49 }
  0x2e   : > { %534 = vmatpush3.bf16.msra.mxu1 %v517_v49 }
  0x30   : > { %303 = vmatmul.mubr.f32.vlgmr.msra.gmra.mrb[0].mxu0 %v202_v50 }
  0x31   : > { %308 = vmatmul.mubr.f32.vlgmr.msra.gmra.mrb[0].mxu1 %v204_v51 }
 0x103   : > { %v481_v52 = vpop.f32.mrb[0].mxu0 }
 0x104   : > { %v484_v53 = vpop.f32.mrb[0].mxu1  ;;  %v482_v54 = vpop.f32.mrb[1].mxu0 }
 0x105   : > { %v485_v55 = vpop.f32.mrb[1].mxu1  ;;  %v483_v56 = vadd.f32 %v482_v54, %v481_v52 }
 0x106   : > { %v486_v57 = vadd.f32 %v485_v55, %v484_v53 }
 0x107   : > { %313 = vadd.xlane.f32.xlu0 %v483_v56 }
 0x10b   : > { %315 = vadd.xlane.f32.xlu0 %v486_v57 }
 0x194   : > { %v314_v58 = vpop.xlane.xlu0 %313 }
 0x195   : > { %v318_v59 = vmul.f32 0.0078125, %v314_v58 }
 0x197   : > { %v320_v60 = vsub.f32 %v483_v56, %v318_v59 }
 0x198   : > { %v316_v61 = vpop.xlane.xlu0 %315 }
 0x199   : > { %v319_v62 = vmul.f32 0.0078125, %v316_v61  ;;  %v322_v63 = vmul.f32 %v320_v60, %v320_v60 }
 0x19b   : > { %v321_v0 = vsub.f32 %v486_v57, %v319_v62  ;;  %324 = vadd.xlane.f32.xlu1 %v322_v63 }
 0x19d   : > { %v323_v1 = vmul.f32 %v321_v0, %v321_v0 }
 0x19f   : > { %326 = vadd.xlane.f32.xlu1 %v323_v1 }
 0x228   : > { %v325_v2 = vpop.xlane.xlu1 %324 }
 0x229   : > { %v328_v3 = vmul.f32 0.0078125, %v325_v2 }
 0x22b   : > { %v330_v4 = vadd.f32 1e-05, %v328_v3 }
 0x22c   : > { %v327_v5 = vpop.xlane.xlu1 %326 }
 0x22d   : > { %576 = vrsqrt.f32 %v330_v4  ;;  %v329_v6 = vmul.f32 0.0078125, %v327_v5 }
 0x22f   : > { %v331_v7 = vadd.f32 1e-05, %v329_v6 }
 0x231   : > { %578 = vrsqrt.f32 %v331_v7 }
 0x237   : > { %v577_v8 = vpop.eup %576 }
 0x238   : > { %v334_v10 = vmul.f32 %v577_v8, %v320_v60 }
 0x23a   : > { %v343_v12 = vmul.f32 %v440_v9, %v334_v10 }
 0x23b   : > { %v579_v13 = vpop.eup %578 }
 0x23c   : > { %v335_v14 = vmul.f32 %v579_v13, %v321_v0  ;;  %v352_v15 = vadd.f32 %v441_v11, %v343_v12 }
 0x23e   : > { %v344_v16 = vmul.f32 %v440_v9, %v335_v14  ;;  %354 = vst [vmem:[%s193_s11] sm:$0xff] %v352_v15 }
 0x240   : > { %v353_v17 = vadd.f32 %v441_v11, %v344_v16 }
 0x242   : > { %355 = vst [vmem:[%s193_s11 + $0x8] sm:$0xff] %v353_v17 }
 0x243   : > { %593 = shalt.err (!%p590_p3)
}
 0x244   : > { %s594_s29 = scalar_lea.hbm %s837_s20, 256  ;;  %s598_s5 = scalar_lea.hbm %s886_s4, 512 }
 0x245   : > { %p595_p4 = scmp.ne.s32.totalorder %s837_s20, %s594_s29  ;;  %p599_p9 = scmp.lt.u32.totalorder %s837_s20, %s886_s4 }
 0x246   : > { %p600_p10 = scmp.lt.u32.totalorder %s598_s5, %s594_s29  ;;  %p602_p12 = scmp.lt.u32.totalorder %s594_s29, %s837_s20 }
 0x247   : > { %p596_p7 = pnand %p595_p4, %p710_p5 }
 0x248   : > { %p601_p11 = por %p600_p10, %p599_p9 }
 0x249   : > { %p597_p8 = pneg %p596_p7 }
 0x24a   : > { %p603_p13 = por %p602_p12, %p601_p11 }
 0x24c   : > { %p604_p0 = pnand %p603_p13, %p597_p8 }
 0x24e   : > { %607 = shalt.err (!%p604_p0)
}
 0x24f   : > { %s645_s9 = smov 128   ;;  %s646_s10 = smov 8  }
 0x250   : > { %535 = dma.vmem_to_hbm [thread:$0]  (%p710_p5), %s839_s12, 256, %s837_s20, %s841_s22, %s645_s9, %s645_s9, %s646_s10  }
 0x251 PF: > { %p541_p1 = scmp.ge.s32.totalorder %s642_s18, 2  ;;  %s385_s11 = sand.u32 1, %s630_s15  }
 0x252   : > { %s386_s13 = scalar_lea.sflag [#allocation3], %s385_s11 }
 0x253   : > { %p538_p2 = pnand %p541_p1, %p714_p6 }
 0x255   : > { %625 = dma.done.wait (!%p538_p2), %s386_s13, 256  }
 0x256   : > { %627 = vsyncadd (!%p538_p2), %s386_s13, 4294967040  ;;  %p14_p3 = scmp.ge.s32.totalorder %s697_s21, 4   ;;  %s889_s15 = smov %s634_s16 }
 0x257   : > { %s890_s16 = smov %s638_s17  ;;  %s891_s17 = smov %s708_s24 }
 0x258   : > { %s892_s18 = smov %s697_s21  ;;  %16 = sbr.rel (!%p14_p3) target bundleno = 3 (0x3), region = 71 }
 0x25f   :  { %391 = vsyncpa [#allocation3], 1 }
 0x260   :  { %393 = vsyncpa [#allocation3 + $0x1], 1 }

</bundles_post_ra>
